<compile_context>
chip_gen: v7x
topology: tpu7x:2x2x1
jax: 0.10.0
libtpu: 0.0.40
codegen_flags: <defaults>
</compile_context>

<pallas_src>
import jax
import jax.numpy as jnp
from jax import lax
from jax.experimental import pallas as pl
from jax.experimental.pallas import tpu as pltpu

EPS = 1e-5


def _round_up(a, b):
    return (a + b - 1) // b * b


def _make_kernel(L, M_valid, Mp, Cin_p, Cout_p, fuse1, fuse2, has_shortcut):
    inv_cnt = 1.0 / float(M_valid)     # BN stats over the N*L valid columns
    need_mask = (M_valid != Mp)        # statically specialize away the pad mask if possible

    def kernel(x_ref, w1_ref, g1_ref, be1_ref, w2_ref, g2_ref, be2_ref, *rest):
        # x_ref : (Cin_p, Mp) f32              lane-dense input slab (channels x N*L)
        # w1_ref: (Cout_p, 3*Cin_p)  mmdt      packed conv1 weights [tap0 | tap1 | tap2]
        # w2_ref: (Cout_p, 3*Cout_p) mmdt      packed conv2 weights
        # ws_ref: (Cout_p, Cin_p)    mmdt      1x1 shortcut weights (only if has_shortcut)
        # g*/be*/bs: (Cout_p, 1) f32           BN gamma / BN beta / shortcut bias
        if has_shortcut:
            ws_ref, bs_ref, out_ref = rest
        else:
            (out_ref,) = rest

        mmdt = w1_ref.dtype                  # MXU input dtype (bf16 or f32)
        x = x_ref[...]                       # f32

        cols = lax.broadcasted_iota(jnp.int32, (1, Mp), 1)
        lpos = cols % L
        not_first = lpos != 0                # column is not l == 0 of its sample
        not_last = lpos != (L - 1)           # column is not l == L-1 of its sample
        if need_mask:
            valid = (cols < M_valid).astype(jnp.float32)   # 1.0 on real columns

        def taps(a):
            # a: (C, Mp) in matmul dtype -> (left, center, right) = (x[m-1], x[m], x[m+1]).
            # Zero "same" conv padding at per-sample boundaries comes from the lane masks.
            # NOTE: correctness relies on M_valid == N*L exactly (pad region starts on an
            # l == 0 boundary) so garbage in pad columns never rolls into valid columns.
            zero = jnp.zeros((), a.dtype)
            left = jnp.where(not_first, pltpu.roll(a, shift=1, axis=1), zero)
            right = jnp.where(not_last, pltpu.roll(a, shift=Mp - 1, axis=1), zero)
            return left, a, right

        def conv3(w_ref, a_mm, C, fused):
            # Conv1d(k=3, pad=1) over the lane-dense slab.  Fused: single MXU dot with
            # K = 3*C (best when K fits the contraction depth).  Otherwise: three
            # accumulated tap dots -> no (3C x Mp) concat slab is ever materialized.
            l, c, r = taps(a_mm)
            if fused:
                col = jnp.concatenate([l, c, r], axis=0)
                return jnp.dot(w_ref[...], col, preferred_element_type=jnp.float32)
            h = jnp.dot(w_ref[:, 0:C], l, preferred_element_type=jnp.float32)
            h = h + jnp.dot(w_ref[:, C:2 * C], c, preferred_element_type=jnp.float32)
            h = h + jnp.dot(w_ref[:, 2 * C:3 * C], r, preferred_element_type=jnp.float32)
            return h

        def batchnorm(h, g, be, relu):
            # one pass: sum & sum-of-squares over valid lanes, folded scale/shift FMA
            hm = h * valid if need_mask else h
            s1 = jnp.sum(hm, axis=1, keepdims=True)
            s2 = jnp.sum(hm * hm, axis=1, keepdims=True)
            mean = s1 * inv_cnt
            var = jnp.maximum(s2 * inv_cnt - mean * mean, 0.0)   # clamp cancellation noise
            scale = g * lax.rsqrt(var + EPS)
            shift = be - mean * scale
            y = h * scale + shift
            return jnp.maximum(y, 0.0) if relu else y

        # cast activations to the matmul dtype ONCE; reused by conv1 taps and the shortcut
        x_mm = x.astype(mmdt)

        # ---- conv1 (bias dropped: cancels under BN) + BN + ReLU --------------------
        h1 = batchnorm(conv3(w1_ref, x_mm, Cin_p, fuse1),
                       g1_ref[...], be1_ref[...], relu=True)

        # ---- conv2 (bias dropped) + BN ---------------------------------------------
        h2 = batchnorm(conv3(w2_ref, h1.astype(mmdt), Cout_p, fuse2),
                       g2_ref[...], be2_ref[...], relu=False)

        # ---- shortcut (+ residual add + ReLU); single write to out_ref --------------
        if has_shortcut:
            res = jnp.dot(ws_ref[...], x_mm,
                          preferred_element_type=jnp.float32) + bs_ref[...]
        else:
            res = x    # identity shortcut (C_in == C_out), exact f32
        out_ref[...] = jnp.maximum(h2 + res, 0.0).astype(out_ref.dtype)

    return kernel


def residual_block(x, params, matmul_dtype=jnp.bfloat16, out_dtype=None, mxu_k=256):
    """x: (N, C_in, L) float32. Returns (N, C_out, L) in out_dtype (default: x.dtype)."""
    w1, b1, g1, be1, w2, b2, g2, be2, ws, bs = params
    del b1, b2  # conv biases cancel exactly under training-mode BN; not sent to the kernel
    N, C_in, L = x.shape
    C_out = w1.shape[1]
    out_dtype = x.dtype if out_dtype is None else out_dtype

    Cin_p = _round_up(C_in, 8)
    Cout_p = _round_up(C_out, 8)
    M = N * L                      # invariant: M == N*L exactly (tap-mask correctness)
    Mp = _round_up(M, 128)

    # ---- layout plumbing (wrapper side): lane-dense, (8,128)-aligned slabs ----
    x2d = jnp.transpose(x, (1, 0, 2)).reshape(C_in, M)
    x2d = jnp.pad(x2d, ((0, Cin_p - C_in), (0, Mp - M)))

    def pack_conv_w(w, ci_p, co_p):
        # (3, C_out, C_in) -> (co_p, 3*ci_p); column blocks ordered [tap0 | tap1 | tap2]
        wp = jnp.pad(w, ((0, 0), (0, co_p - w.shape[1]), (0, ci_p - w.shape[2])))
        return jnp.transpose(wp, (1, 0, 2)).reshape(co_p, 3 * ci_p).astype(matmul_dtype)

    def pad_cvec(v):
        return jnp.pad(v, ((0, Cout_p - C_out), (0, 0)))

    w1s = pack_conv_w(w1, Cin_p, Cout_p)
    w2s = pack_conv_w(w2, Cout_p, Cout_p)

    has_shortcut = ws is not None
    fuse1 = (3 * Cin_p) <= mxu_k       # fused im2col only while K fits MXU contraction depth
    fuse2 = (3 * Cout_p) <= mxu_k

    inputs = [x2d, w1s, pad_cvec(g1), pad_cvec(be1), w2s, pad_cvec(g2), pad_cvec(be2)]
    if has_shortcut:
        wss = jnp.pad(ws, ((0, Cout_p - C_out), (0, Cin_p - C_in))).astype(matmul_dtype)
        inputs += [wss, pad_cvec(bs)]

    # ---- VMEM budget: size the scoped limit to the real working set ----
    mm_b = jnp.dtype(matmul_dtype).itemsize
    out_b = jnp.dtype(out_dtype).itemsize
    est = (4 * Cin_p * Mp                               # x slab (f32)
           + out_b * Cout_p * Mp                        # output slab
           + 4 * 2 * Cout_p * Mp                        # h1 / h2 live in f32
           + mm_b * 4 * max(Cin_p, Cout_p) * Mp         # cast copy + tap views (mmdt)
           + mm_b * (3 * Cin_p + 3 * Cout_p + Cin_p) * Cout_p)   # weights
    vmem_limit = int(min(max(2 * est + (4 << 20), 32 << 20), 100 << 20))

    out2d = pl.pallas_call(
        _make_kernel(L, M, Mp, Cin_p, Cout_p, fuse1, fuse2, has_shortcut),
        out_shape=jax.ShapeDtypeStruct((Cout_p, Mp), out_dtype),
        compiler_params=pltpu.CompilerParams(vmem_limit_bytes=vmem_limit),
    )(*inputs)

    out = out2d[:C_out, :M].reshape(C_out, N, L)
    return jnp.transpose(out, (1, 0, 2))


# ---------------------------- pure-JAX reference ----------------------------
def reference(x, params):
    w1, b1, g1, be1, w2, b2, g2, be2, ws, bs = params

    def conv1d(x, w_oik, b, pad):
        y = lax.conv_general_dilated(
            x, w_oik, window_strides=(1,), padding=[(pad, pad)],
            dimension_numbers=("NCH", "OIH", "NCH"))
        return y + b.reshape(1, -1, 1)

    def bn(h, g, be):
        mean = h.mean(axis=(0, 2), keepdims=True)
        var = ((h - mean) ** 2).mean(axis=(0, 2), keepdims=True)
        return (h - mean) / jnp.sqrt(var + EPS) * g.reshape(1, -1, 1) + be.reshape(1, -1, 1)

    w1_oik = jnp.transpose(w1, (1, 2, 0))       # (C_out, C_in, 3)
    w2_oik = jnp.transpose(w2, (1, 2, 0))       # (C_out, C_out, 3)

    h = jax.nn.relu(bn(conv1d(x, w1_oik, b1, 1), g1, be1))
    h = bn(conv1d(h, w2_oik, b2, 1), g2, be2)
    r = conv1d(x, ws[:, :, None], bs, 0) if ws is not None else x
    return jax.nn.relu(h + r)


def init_params(key, C_in, C_out, shortcut=None):
    if shortcut is None:
        shortcut = (C_in != C_out)       # matches the PyTorch module
    ks = jax.random.split(key, 10)
    w1 = 0.3 * jax.random.normal(ks[0], (3, C_out, C_in), jnp.float32)   # per-tap (k, o, i)
    b1 = 0.1 * jax.random.normal(ks[1], (C_out, 1), jnp.float32)
    g1 = 1.0 + 0.1 * jax.random.normal(ks[2], (C_out, 1), jnp.float32)
    be1 = 0.1 * jax.random.normal(ks[3], (C_out, 1), jnp.float32)
    w2 = 0.3 * jax.random.normal(ks[4], (3, C_out, C_out), jnp.float32)
    b2 = 0.1 * jax.random.normal(ks[5], (C_out, 1), jnp.float32)
    g2 = 1.0 + 0.1 * jax.random.normal(ks[6], (C_out, 1), jnp.float32)
    be2 = 0.1 * jax.random.normal(ks[7], (C_out, 1), jnp.float32)
    if shortcut:
        ws = 0.3 * jax.random.normal(ks[8], (C_out, C_in), jnp.float32)  # 1x1 shortcut
        bs = 0.1 * jax.random.normal(ks[9], (C_out, 1), jnp.float32)
    else:
        ws, bs = None, None
    return (w1, b1, g1, be1, w2, b2, g2, be2, ws, bs)


if __name__ == "__main__":
    key = jax.random.PRNGKey(0)
    k1, k2, k3, k4 = jax.random.split(key, 4)

    # --- case 1: C_in != C_out (1x1 conv shortcut) ---------------------------------
    N, C_in, C_out, L = 2, 4, 8, 16
    x = jax.random.normal(k1, (N, C_in, L), jnp.float32)
    params = init_params(k2, C_in, C_out)
    ref = reference(x, params)

    # strict numerics: f32 MXU inputs, fused-K im2col path
    out_f32 = jax.block_until_ready(residual_block(x, params, matmul_dtype=jnp.float32))
    assert out_f32.shape == (N, C_out, L), out_f32.shape
    err = float(jnp.max(jnp.abs(out_f32 - ref)))
    assert err < 1e-4, f"f32 fused-K path max abs error {err}"

    # perf path: bf16 MXU inputs (activations + weights), f32 accumulation
    out_bf16 = jax.block_until_ready(residual_block(x, params, matmul_dtype=jnp.bfloat16))
    err = float(jnp.max(jnp.abs(out_bf16 - ref)))
    assert err < 1e-1, f"bf16 fused-K path max abs error {err}"

    # exercise the 3-tap accumulated-dot path (auto-selected when 3*C_p > MXU depth)
    out_tap = jax.block_until_ready(
        residual_block(x, params, matmul_dtype=jnp.float32, mxu_k=8))
    err = float(jnp.max(jnp.abs(out_tap - ref)))
    assert err < 1e-4, f"f32 tap-dot path max abs error {err}"

    # --- case 2: C_in == C_out -> identity shortcut (module sets shortcut=None) ----
    C_eq = 8
    x2 = jax.random.normal(k3, (N, C_eq, L), jnp.float32)
    params2 = init_params(k4, C_eq, C_eq)
    ref2 = reference(x2, params2)
    out2 = jax.block_until_ready(residual_block(x2, params2, matmul_dtype=jnp.float32))
    assert out2.shape == (N, C_eq, L), out2.shape
    err = float(jnp.max(jnp.abs(out2 - ref2)))
    assert err < 1e-4, f"identity-shortcut path max abs error {err}"

    print("KERNEL_OK")
</pallas_src>

<mosaic_0001>
module attributes {stable_mosaic.version = 11 : i64} {
  func.func @kernel(%arg0: memref<8x128xf32, #tpu.memory_space<vmem>>, %arg1: memref<8x24xf32, #tpu.memory_space<vmem>>, %arg2: memref<8x1xf32, #tpu.memory_space<vmem>>, %arg3: memref<8x1xf32, #tpu.memory_space<vmem>>, %arg4: memref<8x24xf32, #tpu.memory_space<vmem>>, %arg5: memref<8x1xf32, #tpu.memory_space<vmem>>, %arg6: memref<8x1xf32, #tpu.memory_space<vmem>>, %arg7: memref<8x8xf32, #tpu.memory_space<vmem>>, %arg8: memref<8x1xf32, #tpu.memory_space<vmem>>, %arg9: memref<8x128xf32, #tpu.memory_space<vmem>>) attributes {dimension_semantics = [], scalar_prefetch = 0 : i64, scratch_operands = 0 : i64, tpu.core_type = #tpu.core_type<tc>} {
    %c0 = arith.constant 0 : index
    %c0_0 = arith.constant 0 : index
    %0 = vector.load %arg0[%c0, %c0_0] : memref<8x128xf32, #tpu.memory_space<vmem>>, vector<8x128xf32>
    %1 = tpu.iota {dimensions = array<i32: 1>} : vector<1x128xi32>
    %c16_i32 = arith.constant 16 : i32
    %c0_i32 = arith.constant 0 : i32
    %2 = arith.cmpi eq, %c16_i32, %c0_i32 : i32
    %c1_i32 = arith.constant 1 : i32
    %3 = arith.select %2, %c1_i32, %c16_i32 : i32
    %4 = vector.broadcast %3 : i32 to vector<1x128xi32>
    %5 = arith.remsi %1, %4 : vector<1x128xi32>
    %c0_i32_1 = arith.constant 0 : i32
    %6 = vector.broadcast %c0_i32_1 : i32 to vector<1x128xi32>
    %7 = arith.cmpi ne, %5, %6 : vector<1x128xi32>
    %c0_i32_2 = arith.constant 0 : i32
    %8 = vector.broadcast %c0_i32_2 : i32 to vector<1x128xi32>
    %9 = arith.cmpi slt, %5, %8 : vector<1x128xi32>
    %c0_i32_3 = arith.constant 0 : i32
    %10 = arith.cmpi slt, %3, %c0_i32_3 : i32
    %11 = vector.broadcast %10 : i1 to vector<1x128xi1>
    %12 = vector.broadcast %11 : vector<1x128xi1> to vector<1x128xi1>
    %13 = arith.xori %9, %12 : vector<1x128xi1>
    %14 = arith.andi %13, %7 : vector<1x128xi1>
    %15 = vector.broadcast %3 : i32 to vector<1x128xi32>
    %16 = arith.addi %5, %15 : vector<1x128xi32>
    %17 = arith.select %14, %16, %5 : vector<1x128xi1>, vector<1x128xi32>
    %c0_i32_4 = arith.constant 0 : i32
    %18 = vector.broadcast %c0_i32_4 : i32 to vector<1x128xi32>
    %19 = arith.cmpi ne, %17, %18 : vector<1x128xi32>
    %c15_i32 = arith.constant 15 : i32
    %20 = vector.broadcast %c15_i32 : i32 to vector<1x128xi32>
    %21 = arith.cmpi ne, %17, %20 : vector<1x128xi32>
    %c32_i32 = arith.constant 32 : i32
    %22 = vector.broadcast %c32_i32 : i32 to vector<1x128xi32>
    %23 = arith.cmpi slt, %1, %22 : vector<1x128xi32>
    %24 = arith.extui %23 : vector<1x128xi1> to vector<1x128xi32>
    %25 = arith.sitofp %24 : vector<1x128xi32> to vector<1x128xf32>
    %c1_i32_5 = arith.constant 1 : i32
    %26 = tpu.dynamic_rotate %0 by %c1_i32_5 dim 1 : vector<8x128xf32>, i32 -> vector<8x128xf32>
    %cst = arith.constant 0.000000e+00 : f32
    %27 = vector.shape_cast %19 : vector<1x128xi1> to vector<1x128xi1>
    %28 = vector.broadcast %27 : vector<1x128xi1> to vector<8x128xi1>
    %29 = vector.broadcast %cst : f32 to vector<8x128xf32>
    %30 = arith.select %28, %26, %29 : vector<8x128xi1>, vector<8x128xf32>
    %c127_i32 = arith.constant 127 : i32
    %31 = tpu.dynamic_rotate %0 by %c127_i32 dim 1 : vector<8x128xf32>, i32 -> vector<8x128xf32>
    %cst_6 = arith.constant 0.000000e+00 : f32
    %32 = vector.shape_cast %21 : vector<1x128xi1> to vector<1x128xi1>
    %33 = vector.broadcast %32 : vector<1x128xi1> to vector<8x128xi1>
    %34 = vector.broadcast %cst_6 : f32 to vector<8x128xf32>
    %35 = arith.select %33, %31, %34 : vector<8x128xi1>, vector<8x128xf32>
    %36 = tpu.concatenate %30, %0, %35 in 0 : vector<8x128xf32>, vector<8x128xf32>, vector<8x128xf32> -> vector<24x128xf32>
    %c0_7 = arith.constant 0 : index
    %c0_8 = arith.constant 0 : index
    %37 = vector.load %arg1[%c0_7, %c0_8] : memref<8x24xf32, #tpu.memory_space<vmem>>, vector<8x24xf32>
    %cst_9 = arith.constant dense<0.000000e+00> : vector<8x128xf32>
    %38 = tpu.matmul %37, %36, %cst_9 {dimension_numbers = #tpu.dot_dimension_numbers<[1], [0], [0], [1], [0, 0, 1, 1], [], []>} : vector<8x24xf32>, vector<24x128xf32>, vector<8x128xf32> -> vector<8x128xf32>
    %c0_10 = arith.constant 0 : index
    %c0_11 = arith.constant 0 : index
    %39 = vector.load %arg2[%c0_10, %c0_11] : memref<8x1xf32, #tpu.memory_space<vmem>>, vector<8x1xf32>
    %c0_12 = arith.constant 0 : index
    %c0_13 = arith.constant 0 : index
    %40 = vector.load %arg3[%c0_12, %c0_13] : memref<8x1xf32, #tpu.memory_space<vmem>>, vector<8x1xf32>
    %41 = vector.broadcast %25 : vector<1x128xf32> to vector<8x128xf32>
    %42 = arith.mulf %38, %41 : vector<8x128xf32>
    %cst_14 = arith.constant dense<0.000000e+00> : vector<8xf32>
    %43 = vector.multi_reduction <add>, %42, %cst_14 [1] : vector<8x128xf32> to vector<8xf32>
    %44 = vector.shape_cast %43 : vector<8xf32> to vector<8x1xf32>
    %45 = arith.mulf %42, %42 : vector<8x128xf32>
    %cst_15 = arith.constant dense<0.000000e+00> : vector<8xf32>
    %46 = vector.multi_reduction <add>, %45, %cst_15 [1] : vector<8x128xf32> to vector<8xf32>
    %47 = vector.shape_cast %46 : vector<8xf32> to vector<8x1xf32>
    %cst_16 = arith.constant 3.125000e-02 : f32
    %48 = vector.broadcast %cst_16 : f32 to vector<8x1xf32>
    %49 = arith.mulf %44, %48 : vector<8x1xf32>
    %cst_17 = arith.constant 3.125000e-02 : f32
    %50 = vector.broadcast %cst_17 : f32 to vector<8x1xf32>
    %51 = arith.mulf %47, %50 : vector<8x1xf32>
    %52 = arith.mulf %49, %49 : vector<8x1xf32>
    %53 = arith.subf %51, %52 : vector<8x1xf32>
    %cst_18 = arith.constant 0.000000e+00 : f32
    %54 = vector.broadcast %cst_18 : f32 to vector<8x1xf32>
    %55 = arith.maximumf %53, %54 : vector<8x1xf32>
    %cst_19 = arith.constant 9.99999974E-6 : f32
    %56 = vector.broadcast %cst_19 : f32 to vector<8x1xf32>
    %57 = arith.addf %55, %56 : vector<8x1xf32>
    %58 = math.rsqrt %57 : vector<8x1xf32>
    %59 = arith.mulf %39, %58 : vector<8x1xf32>
    %60 = arith.mulf %49, %59 : vector<8x1xf32>
    %61 = arith.subf %40, %60 : vector<8x1xf32>
    %62 = vector.broadcast %59 : vector<8x1xf32> to vector<8x128xf32>
    %63 = arith.mulf %38, %62 : vector<8x128xf32>
    %64 = vector.broadcast %61 : vector<8x1xf32> to vector<8x128xf32>
    %65 = arith.addf %63, %64 : vector<8x128xf32>
    %cst_20 = arith.constant 0.000000e+00 : f32
    %66 = vector.broadcast %cst_20 : f32 to vector<8x128xf32>
    %67 = arith.maximumf %65, %66 : vector<8x128xf32>
    %c1_i32_21 = arith.constant 1 : i32
    %68 = tpu.dynamic_rotate %67 by %c1_i32_21 dim 1 : vector<8x128xf32>, i32 -> vector<8x128xf32>
    %cst_22 = arith.constant 0.000000e+00 : f32
    %69 = vector.shape_cast %19 : vector<1x128xi1> to vector<1x128xi1>
    %70 = vector.broadcast %69 : vector<1x128xi1> to vector<8x128xi1>
    %71 = vector.broadcast %cst_22 : f32 to vector<8x128xf32>
    %72 = arith.select %70, %68, %71 : vector<8x128xi1>, vector<8x128xf32>
    %c127_i32_23 = arith.constant 127 : i32
    %73 = tpu.dynamic_rotate %67 by %c127_i32_23 dim 1 : vector<8x128xf32>, i32 -> vector<8x128xf32>
    %cst_24 = arith.constant 0.000000e+00 : f32
    %74 = vector.shape_cast %21 : vector<1x128xi1> to vector<1x128xi1>
    %75 = vector.broadcast %74 : vector<1x128xi1> to vector<8x128xi1>
    %76 = vector.broadcast %cst_24 : f32 to vector<8x128xf32>
    %77 = arith.select %75, %73, %76 : vector<8x128xi1>, vector<8x128xf32>
    %78 = tpu.concatenate %72, %67, %77 in 0 : vector<8x128xf32>, vector<8x128xf32>, vector<8x128xf32> -> vector<24x128xf32>
    %c0_25 = arith.constant 0 : index
    %c0_26 = arith.constant 0 : index
    %79 = vector.load %arg4[%c0_25, %c0_26] : memref<8x24xf32, #tpu.memory_space<vmem>>, vector<8x24xf32>
    %cst_27 = arith.constant dense<0.000000e+00> : vector<8x128xf32>
    %80 = tpu.matmul %79, %78, %cst_27 {dimension_numbers = #tpu.dot_dimension_numbers<[1], [0], [0], [1], [0, 0, 1, 1], [], []>} : vector<8x24xf32>, vector<24x128xf32>, vector<8x128xf32> -> vector<8x128xf32>
    %c0_28 = arith.constant 0 : index
    %c0_29 = arith.constant 0 : index
    %81 = vector.load %arg5[%c0_28, %c0_29] : memref<8x1xf32, #tpu.memory_space<vmem>>, vector<8x1xf32>
    %c0_30 = arith.constant 0 : index
    %c0_31 = arith.constant 0 : index
    %82 = vector.load %arg6[%c0_30, %c0_31] : memref<8x1xf32, #tpu.memory_space<vmem>>, vector<8x1xf32>
    %83 = vector.broadcast %25 : vector<1x128xf32> to vector<8x128xf32>
    %84 = arith.mulf %80, %83 : vector<8x128xf32>
    %cst_32 = arith.constant dense<0.000000e+00> : vector<8xf32>
    %85 = vector.multi_reduction <add>, %84, %cst_32 [1] : vector<8x128xf32> to vector<8xf32>
    %86 = vector.shape_cast %85 : vector<8xf32> to vector<8x1xf32>
    %87 = arith.mulf %84, %84 : vector<8x128xf32>
    %cst_33 = arith.constant dense<0.000000e+00> : vector<8xf32>
    %88 = vector.multi_reduction <add>, %87, %cst_33 [1] : vector<8x128xf32> to vector<8xf32>
    %89 = vector.shape_cast %88 : vector<8xf32> to vector<8x1xf32>
    %cst_34 = arith.constant 3.125000e-02 : f32
    %90 = vector.broadcast %cst_34 : f32 to vector<8x1xf32>
    %91 = arith.mulf %86, %90 : vector<8x1xf32>
    %cst_35 = arith.constant 3.125000e-02 : f32
    %92 = vector.broadcast %cst_35 : f32 to vector<8x1xf32>
    %93 = arith.mulf %89, %92 : vector<8x1xf32>
    %94 = arith.mulf %91, %91 : vector<8x1xf32>
    %95 = arith.subf %93, %94 : vector<8x1xf32>
    %cst_36 = arith.constant 0.000000e+00 : f32
    %96 = vector.broadcast %cst_36 : f32 to vector<8x1xf32>
    %97 = arith.maximumf %95, %96 : vector<8x1xf32>
    %cst_37 = arith.constant 9.99999974E-6 : f32
    %98 = vector.broadcast %cst_37 : f32 to vector<8x1xf32>
    %99 = arith.addf %97, %98 : vector<8x1xf32>
    %100 = math.rsqrt %99 : vector<8x1xf32>
    %101 = arith.mulf %81, %100 : vector<8x1xf32>
    %102 = arith.mulf %91, %101 : vector<8x1xf32>
    %103 = arith.subf %82, %102 : vector<8x1xf32>
    %104 = vector.broadcast %101 : vector<8x1xf32> to vector<8x128xf32>
    %105 = arith.mulf %80, %104 : vector<8x128xf32>
    %106 = vector.broadcast %103 : vector<8x1xf32> to vector<8x128xf32>
    %107 = arith.addf %105, %106 : vector<8x128xf32>
    %c0_38 = arith.constant 0 : index
    %c0_39 = arith.constant 0 : index
    %108 = vector.load %arg7[%c0_38, %c0_39] : memref<8x8xf32, #tpu.memory_space<vmem>>, vector<8x8xf32>
    %cst_40 = arith.constant dense<0.000000e+00> : vector<8x128xf32>
    %109 = tpu.matmul %108, %0, %cst_40 {dimension_numbers = #tpu.dot_dimension_numbers<[1], [0], [0], [1], [0, 0, 1, 1], [], []>} : vector<8x8xf32>, vector<8x128xf32>, vector<8x128xf32> -> vector<8x128xf32>
    %c0_41 = arith.constant 0 : index
    %c0_42 = arith.constant 0 : index
    %110 = vector.load %arg8[%c0_41, %c0_42] : memref<8x1xf32, #tpu.memory_space<vmem>>, vector<8x1xf32>
    %111 = vector.broadcast %110 : vector<8x1xf32> to vector<8x128xf32>
    %112 = arith.addf %109, %111 : vector<8x128xf32>
    %113 = arith.addf %107, %112 : vector<8x128xf32>
    %cst_43 = arith.constant 0.000000e+00 : f32
    %114 = vector.broadcast %cst_43 : f32 to vector<8x128xf32>
    %115 = arith.maximumf %113, %114 : vector<8x128xf32>
    %c0_44 = arith.constant 0 : index
    %c0_45 = arith.constant 0 : index
    %116 = vector.load %arg9[%c0_44, %c0_45] : memref<8x128xf32, #tpu.memory_space<vmem>>, vector<8x128xf32>
    tpu.vector_store %arg9[%c0_44, %c0_45], %115 {strides = array<i32>} : memref<8x128xf32, #tpu.memory_space<vmem>>, vector<8x128xf32>,
    return
  }
}

</mosaic_0001>

<bundles_post_ra>
// kernel: tpu_custom_call.1
= control target key start
LH: loop header
LB: loop body
LE: loop exit
PB: predicated region body
PF: predicated region fallthrough
CT: control target
= control target key end

     0   :  { %s464_s11 = smov 1   ;;  %v465_v1 = vmov 0.0|0.0   ;;  %s593_s0 = inlined_call_operand.vmem [shape: f32[8,128], index: 0, kind: input, shape index: {}]   ;;  %s594_s1 = inlined_call_operand.vmem [shape: f32[8,24], index: 1, kind: input, shape index: {}]   ;;  %s595_s2 = inlined_call_operand.vmem [shape: f32[8,1], index: 2, kind: input, shape index: {}]   ;;  %s596_s3 = inlined_call_operand.vmem [shape: f32[8,1], index: 3, kind: input, shape index: {}]   ;;  %s597_s4 = inlined_call_operand.vmem [shape: f32[8,24], index: 4, kind: input, shape index: {}]   ;;  %s598_s5 = inlined_call_operand.vmem [shape: f32[8,1], index: 5, kind: input, shape index: {}]   ;;  %s599_s6 = inlined_call_operand.vmem [shape: f32[8,1], index: 6, kind: input, shape index: {}]   ;;  %s600_s7 = inlined_call_operand.vmem [shape: f32[8,8], index: 7, kind: input, shape index: {}]   ;;  %s601_s8 = inlined_call_operand.vmem [shape: f32[8,1], index: 8, kind: input, shape index: {}]   ;;  %s602_s9 = inlined_call_operand.hbm [shape: f32[8,128], index: 9, kind: output, shape index: {}]  }
   0x1   :  { %v33_v0 = vld [vmem:[%s593_s0] sm:$0xff]  ;;  %418 = vmatprep.subr.bf16.mxu0 %v465_v1 }
   0x2   :  { %53 = vrot.lane.b32.xlu0 %v33_v0, %s464_s11 }
   0x3   :  { %14 = vsyncpa [#allocation3], 0  ;;  %vm466_vm0 = vmmov 0   ;;  %v467_v2 = vmov 0.0   ;;  %422 = vmatprep.subr.bf16.mxu1 %v465_v1  ;;  %s468_s12 = smov 127   ;;  %v34_v3 = vlaneseq  ;;  %vm469_vm2 = vmmov 1  }
   0x4   :  { %401 = vmatprep.mubr.msk.f32.mxu0 %vm466_vm0, %v467_v2  ;;  %410 = vmatprep.mubr.msk.f32.mxu1 %vm466_vm0, %v467_v2  ;;  %v63_v11 = vld [vmem:[%s594_s1] sm:$0xff]  ;;  %vm64_vm5 = vcmask 195584   ;;  %v470_v17 = vmov 0   ;;  %vm286_vm7 = vcmask 64512  }
   0x5   :  { %v35_v4 = vand.u32 127, %v34_v3  ;;  %434 = vset.pattern.permute.xlu0 %v470_v17  ;;  %435 = vset.pattern.permute.xlu1 %v470_v17  ;;  %v138_v26 = vld [vmem:[%s595_s2] sm:$0xff] }
   0x6   :  { %58 = vrot.lane.b32.xlu0 %v33_v0, %s468_s12  ;;  %v139_v29 = vld [vmem:[%s596_s3] sm:$0xff] }
   0x7   :  { %v40_v5 = vand.u32 15, %v35_v4  ;;  %vm50_vm6 = vcmp.lt.s32.totalorder %v35_v4, 32  ;;  %v175_v39 = vld [vmem:[%s597_s4] sm:$0xff] }
   0x8   :  { %v377_v12 = vsel %vm50_vm6, 1.0, %v467_v2  ;;  %v279_v41 = vld [vmem:[%s600_s7] sm:$0xff] }
   0x9   :  { %vm48_vm1 = vcmp.ne.s32.totalorder %v40_v5, 0  ;;  %vm538_vm4 = vcmp.ne.s32.totalorder %v40_v5, 15  ;;  %v249_v54 = vld [vmem:[%s598_s5] sm:$0xff]  ;;  %s471_s5 = smov [#allocation2]  }
   0xa   :  { %vm531_vm3 = vmpackc.low %vm469_vm2, %vm48_vm1  ;;  %v250_v57 = vld [vmem:[%s599_s6] sm:$0xff]  ;;  %s369_s23 = sshll.u32 %s471_s5, 4  ;;  %s370_s23 = int_to_ptr.vmem [resolvable:$true] %s369_s23 }
   0xb   :  { %v280_v60 = vld [vmem:[%s601_s8] sm:$0xff]  ;;  %s440_s6 = scalar_lea.vmem %s370_s23, 128  ;;  %p445_p1 = scmp.lt.s32.totalorder %s370_s23, %s370_s23 }
   0xc   :  { %p441_p0 = scmp.ne.s32.totalorder %s370_s23, %s440_s6  ;;  %p446_p2 = scmp.lt.s32.totalorder %s440_s6, %s440_s6 }
   0xe   :  { %p447_p3 = por %p446_p2, %p445_p1 }
  0x10   :  { %p448_p4 = pnand %p447_p3, %p441_p0 }
  0x74   :  { %v54_v6 = vpop.permute.xlu0 %53 }
  0x75   :  { %v419_v8 = vpack.c.bf16 %v33_v0, %v54_v6 }
  0x77   :  { %421 = vmatpush3.bf16.msk.msra.mxu0 %vm531_vm3, %v419_v8 }
  0x78   :  { %399 = vmatprep.subr.mxu0 %v467_v2  ;;  %v59_v9 = vpop.permute.xlu0 %58 }
  0x7b   :  { %400 = vmatpush3.msk.msra.mxu0 %vm538_vm4, %v59_v9 }
  0x7c   :  { %402 = vmatmul.mubr.msk.f32.vlgmr.msra.gmra.mrb[0].mxu0 %vm64_vm5, %v63_v11  ;;  %413 = vmatprep.subr.mxu0 %v467_v2 }
  0x7d   :  { %414 = vmatpush3.msra.mxu0 %v33_v0  ;;  %415 = vmatprep.mubr.msk.f32.mxu0 %vm466_vm0, %v467_v2 }
  0x80   :  { %416 = vmatmul.mubr.msk.f32.vlgmr.msra.gmra.mrb[2].mxu0 %vm286_vm7, %v279_v41 }
 0x14f   :  { %v134_v13 = vpop.f32.mrb[0].mxu0 }
 0x150   :  { %v403_v14 = vpop.f32.mrb[1].mxu0  ;;  %v140_v15 = vmul.f32 %v377_v12, %v134_v13 }
 0x152   :  { %141 = vadd.xlane.f32.xlu1 %v140_v15  ;;  %v143_v16 = vmul.f32 %v140_v15, %v140_v15 }
 0x153   :  { %v356_v59 = vpop.f32.mrb[2].mxu0 }
 0x154   :  { %v417_v61 = vpop.f32.mrb[3].mxu0 }
 0x156   :  { %144 = vadd.xlane.f32.xlu1 %v143_v16 }
 0x1df   :  { %v142_v18 = vpop.xlane.xlu1 %141 }
 0x1e0   :  { %v146_v19 = vmul.f32 0.03125, %v142_v18 }
 0x1e2   :  { %v148_v21 = vmul.f32 %v146_v19, %v146_v19 }
 0x1e3   :  { %v145_v20 = vpop.xlane.xlu1 %144 }
 0x1e4   :  { %v147_v22 = vmul.f32 0.03125, %v145_v20 }
 0x1e6   :  { %v149_v23 = vsub.f32 %v147_v22, %v148_v21 }
 0x1e8   :  { %v150_v24 = vmax.f32 %v149_v23, 0.0 }
 0x1ea   :  { %v151_v25 = vadd.f32 1e-05, %v150_v24 }
 0x1ec   :  { %436 = vrsqrt.f32 %v151_v25 }
 0x1f6   :  { %v437_v27 = vpop.eup %436 }
 0x1f7   :  { %v153_v28 = vmul.f32 %v437_v27, %v138_v26 }
 0x1f9   :  { %158 = vperm.xlu0 %434, %v153_v28   ;;  %v154_v30 = vmul.f32 %v153_v28, %v146_v19 }
 0x1fb   :  { %v155_v31 = vsub.f32 %v139_v29, %v154_v30 }
 0x1fd   :  { %164 = vperm.xlu1 %435, %v155_v31  }
 0x278   :  { %v159_v32 = vpop.permute.xlu0 %158 }
 0x279   :  { %v161_v33 = vmul.f32 %v159_v32, %v134_v13 }
 0x27c   :  { %v165_v34 = vpop.permute.xlu1 %164 }
 0x27d   :  { %v167_v35 = vadd.f32 %v165_v34, %v161_v33 }
 0x27f   :  { %v168_v36 = vmax.f32 %v167_v35, 0.0 }
 0x281   :  { %169 = vrot.lane.b32.xlu0 %v168_v36, %s464_s11 }
 0x285   :  { %172 = vrot.lane.b32.xlu0 %v168_v36, %s468_s12 }
 0x2f3   :  { %v170_v37 = vpop.permute.xlu0 %169 }
 0x2f4   :  { %v423_v38 = vpack.c.bf16 %v168_v36, %v170_v37 }
 0x2f6   :  { %425 = vmatpush3.bf16.msk.msra.mxu1 %vm531_vm3, %v423_v38 }
 0x2f7   :  { %408 = vmatprep.subr.mxu1 %v467_v2  ;;  %v173_v40 = vpop.permute.xlu0 %172 }
 0x2fa   :  { %409 = vmatpush3.msk.msra.mxu1 %vm538_vm4, %v173_v40 }
 0x2fb   :  { %411 = vmatmul.mubr.msk.f32.vlgmr.msra.gmra.mrb[0].mxu1 %vm64_vm5, %v175_v39 }
 0x3ce   :  { %v245_v42 = vpop.f32.mrb[0].mxu1 }
 0x3cf   :  { %v412_v43 = vpop.f32.mrb[1].mxu1  ;;  %v251_v44 = vmul.f32 %v377_v12, %v245_v42 }
 0x3d1   :  { %252 = vadd.xlane.f32.xlu0 %v251_v44  ;;  %v254_v45 = vmul.f32 %v251_v44, %v251_v44 }
 0x3d3   :  { %255 = vadd.xlane.f32.xlu1 %v254_v45 }
 0x45e   :  { %v253_v46 = vpop.xlane.xlu0 %252 }
 0x45f   :  { %v257_v47 = vmul.f32 0.03125, %v253_v46 }
 0x460   :  { %v256_v48 = vpop.xlane.xlu1 %255 }
 0x461   :  { %v259_v49 = vmul.f32 %v257_v47, %v257_v47  ;;  %v258_v50 = vmul.f32 0.03125, %v256_v48 }
 0x463   :  { %v260_v51 = vsub.f32 %v258_v50, %v259_v49 }
 0x465   :  { %v261_v52 = vmax.f32 %v260_v51, 0.0 }
 0x467   :  { %v262_v53 = vadd.f32 1e-05, %v261_v52 }
 0x469   :  { %438 = vrsqrt.f32 %v262_v53 }
 0x473   :  { %v439_v55 = vpop.eup %438 }
 0x474   :  { %v264_v56 = vmul.f32 %v439_v55, %v249_v54 }
 0x476   :  { %269 = vperm.xlu0 %434, %v264_v56   ;;  %v265_v58 = vmul.f32 %v264_v56, %v257_v47 }
 0x478   :  { %v266_v62 = vsub.f32 %v250_v57, %v265_v58 }
 0x47a   :  { %283 = vperm.xlu0 %434, %v280_v60   ;;  %275 = vperm.xlu1 %435, %v266_v62  }
 0x4f5   :  { %v270_v63 = vpop.permute.xlu0 %269 }
 0x4f6   :  { %v272_v0 = vmul.f32 %v270_v63, %v245_v42 }
 0x4f9   :  { %v284_v1 = vpop.permute.xlu0 %283  ;;  %v276_v2 = vpop.permute.xlu1 %275 }
 0x4fa   :  { %v357_v3 = vadd.f32 %v356_v59, %v284_v1  ;;  %v278_v4 = vadd.f32 %v276_v2, %v272_v0 }
 0x4fc   :  { %v360_v5 = vadd.f32 %v357_v3, %v278_v4 }
 0x4fe   :  { %v361_v6 = vmax.f32 %v360_v5, 0.0 }
 0x500   :  { %362 = vst [vmem:[#allocation2] sm:$0xff] %v361_v6 }
 0x501   :  { %451 = shalt.err (!%p448_p4)
}
 0x502   :  { %s452_s25 = scalar_lea.hbm %s602_s9, 128 }
 0x503   :  { %p453_p5 = scmp.ne.s32.totalorder %s602_s9, %s452_s25  ;;  %p456_p6 = scmp.lt.u32.totalorder %s452_s25, %s602_s9 }
 0x505   :  { %p458_p7 = pnand %p456_p6, %p453_p5 }
 0x507   :  { %461 = shalt.err (!%p458_p7)
}
 0x508   :  { %372 = dma.vmem_to_hbm [thread:$0]  %s370_s23, 128, %s602_s9, [#allocation3]  }
 0x509   :  { %462 = dma.done.wait [#allocation3], 128  }
 0x50a   :  { %463 = vsyncadd [#allocation3], 4294967168 }
 0x50b   :  { %376 = vsyncpa [#allocation3], 1 }

</bundles_post_ra>
